<compile_context>
chip_gen: v7x
topology: tpu7x:2x2x1
jax: 0.10.0
libtpu: 0.0.40
codegen_flags: <defaults>
</compile_context>

<pallas_src>
import jax
import jax.numpy as jnp
from jax.experimental import pallas as pl
from jax.experimental.pallas import tpu as pltpu  # noqa: F401  (TPU backend)


def _linear_hardswish_kernel(x_ref, wq_ref, scale_ref, b_ref, o_ref):
    # int8 weight tile -> bf16 on the VPU (two cheap converts; safe lowering path),
    # then bf16 x bf16 on the MXU with f32 accumulation.
    w = wq_ref[...].astype(jnp.float32).astype(jnp.bfloat16)
    acc = jnp.dot(x_ref[...], w, preferred_element_type=jnp.float32)
    # Fused per-output-channel dequant + bias, then the gate:
    #   v0 * hardtanh(v0, 0, 6) / 6  ==  v0 * clip(v0 * (1/6), 0, 1)
    v0 = acc * scale_ref[...] + b_ref[...]
    gate = jnp.clip(v0 * (1.0 / 6.0), 0.0, 1.0)
    o_ref[...] = (v0 * gate).astype(o_ref.dtype)


@jax.jit
def linear_hardswish(x, wq, scale, b2):
    """x: (B, K) f32, wq: (K, N) int8, scale: (1, N) f32, b2: (1, N) f32 -> (B, N) f32."""
    B, K = x.shape
    N = wq.shape[1]
    x_bf16 = x.astype(jnp.bfloat16)  # cast outside the kernel: halves x DMA bytes

    cost = pl.CostEstimate(
        flops=2 * B * K * N,
        transcendentals=0,
        bytes_accessed=K * N * 1 + 2 * N * 4 + B * K * 2 + B * N * 4,
    )

    return pl.pallas_call(
        _linear_hardswish_kernel,
        out_shape=jax.ShapeDtypeStruct((B, N), jnp.float32),
        grid=(1,),
        in_specs=[
            pl.BlockSpec((B, K), lambda i: (0, 0)),   # x (bf16), whole array
            pl.BlockSpec((K, N), lambda i: (0, 0)),   # int8 weight, whole array
            pl.BlockSpec((1, N), lambda i: (0, 0)),   # per-channel dequant scale
            pl.BlockSpec((1, N), lambda i: (0, 0)),   # bias
        ],
        out_specs=pl.BlockSpec((B, N), lambda i: (0, 0)),
        cost_estimate=cost,
    )(x_bf16, wq, scale, b2)


def prepare_params(w, b):
    """One-time init-side prep: transpose + per-output-channel int8 quant + bias reshape.

    w: (N, K) f32 PyTorch-layout weight, b: (N,) f32.
    Returns wq (K, N) int8, scale (1, N) f32, b2 (1, N) f32.
    """
    wt = jnp.asarray(w.T, dtype=jnp.float32)                       # (K, N)
    scale = jnp.max(jnp.abs(wt), axis=0, keepdims=True) / 127.0    # (1, N)
    scale = jnp.where(scale == 0.0, jnp.float32(1.0), scale)       # guard all-zero cols
    wq = jnp.clip(jnp.round(wt / scale), -127.0, 127.0).astype(jnp.int8)
    b2 = jnp.asarray(b, dtype=jnp.float32).reshape(1, -1)
    return wq, scale.astype(jnp.float32), b2


if __name__ == "__main__":
    key = jax.random.PRNGKey(0)
    k_x, k_w, k_b = jax.random.split(key, 3)

    in_features, out_features = 288, 512
    batch = 1

    # Deterministic "Linear" parameter init (PyTorch-style uniform bound).
    bound = 1.0 / (in_features ** 0.5)
    w = jax.random.uniform(k_w, (out_features, in_features),
                           minval=-bound, maxval=bound, dtype=jnp.float32)
    b = jax.random.uniform(k_b, (out_features,),
                           minval=-bound, maxval=bound, dtype=jnp.float32)
    x0 = jax.random.normal(k_x, (batch, in_features), dtype=jnp.float32)

    # One-time init-side weight prep (never touches the forward hot path).
    wq, scale, b2 = prepare_params(w, b)

    out = linear_hardswish(x0, wq, scale, b2)
    jax.block_until_ready(out)

    # Cross-check against a plain-f32 JAX reference of the PyTorch module.
    v0 = x0 @ w.T + b
    ref = v0 * jnp.clip(v0, 0.0, 6.0) / 6.0
    assert out.shape == (batch, out_features)
    # bf16 activations + int8 per-channel weights -> loosened tolerance vs f32 ref.
    assert jnp.allclose(out, ref, atol=5e-2, rtol=5e-2)

    print("KERNEL_OK")
</pallas_src>

<mosaic_0001>
module attributes {stable_mosaic.version = 11 : i64} {
  func.func @_linear_hardswish_kernel(%arg0: i32, %arg1: memref<1x288xbf16, #tpu.memory_space<vmem>>, %arg2: memref<288x512xi8, #tpu.memory_space<vmem>>, %arg3: memref<1x512xf32, #tpu.memory_space<vmem>>, %arg4: memref<1x512xf32, #tpu.memory_space<vmem>>, %arg5: memref<1x512xf32, #tpu.memory_space<vmem>>) attributes {dimension_semantics = [#tpu.dimension_semantics<arbitrary>], iteration_bounds = array<i64: 1>, scalar_prefetch = 0 : i64, scratch_operands = 0 : i64, tpu.core_type = #tpu.core_type<tc>, window_params = [{pipeline_mode = #tpu.pipeline_mode<synchronous>, transform_indices = @transform_0, window_bounds = array<i64: 1, 288>}, {pipeline_mode = #tpu.pipeline_mode<synchronous>, transform_indices = @transform_1, window_bounds = array<i64: 288, 512>}, {pipeline_mode = #tpu.pipeline_mode<synchronous>, transform_indices = @transform_2, window_bounds = array<i64: 1, 512>}, {pipeline_mode = #tpu.pipeline_mode<synchronous>, transform_indices = @transform_3, window_bounds = array<i64: 1, 512>}, {pipeline_mode = #tpu.pipeline_mode<synchronous>, transform_indices = @transform_4, window_bounds = array<i64: 1, 512>}]} {
    %c0 = arith.constant 0 : index
    %c0_0 = arith.constant 0 : index
    %0 = vector.load %arg2[%c0, %c0_0] : memref<288x512xi8, #tpu.memory_space<vmem>>, vector<288x512xi8>
    %1 = arith.sitofp %0 : vector<288x512xi8> to vector<288x512xf32>
    %2 = arith.truncf %1 : vector<288x512xf32> to vector<288x512xbf16>
    %c0_1 = arith.constant 0 : index
    %c0_2 = arith.constant 0 : index
    %3 = vector.load %arg1[%c0_1, %c0_2] : memref<1x288xbf16, #tpu.memory_space<vmem>>, vector<1x288xbf16>
    %cst = arith.constant dense<0.000000e+00> : vector<1x512xf32>
    %4 = tpu.matmul %3, %2, %cst {dimension_numbers = #tpu.dot_dimension_numbers<[1], [0], [0], [1], [0, 0, 1, 1], [], []>} : vector<1x288xbf16>, vector<288x512xbf16>, vector<1x512xf32> -> vector<1x512xf32>
    %c0_3 = arith.constant 0 : index
    %c0_4 = arith.constant 0 : index
    %5 = vector.load %arg3[%c0_3, %c0_4] : memref<1x512xf32, #tpu.memory_space<vmem>>, vector<1x512xf32>
    %6 = arith.mulf %4, %5 : vector<1x512xf32>
    %c0_5 = arith.constant 0 : index
    %c0_6 = arith.constant 0 : index
    %7 = vector.load %arg4[%c0_5, %c0_6] : memref<1x512xf32, #tpu.memory_space<vmem>>, vector<1x512xf32>
    %8 = arith.addf %6, %7 : vector<1x512xf32>
    %cst_7 = arith.constant 0.166666672 : f32
    %9 = vector.broadcast %cst_7 : f32 to vector<1x512xf32>
    %10 = arith.mulf %8, %9 : vector<1x512xf32>
    %cst_8 = arith.constant 0.000000e+00 : f32
    %cst_9 = arith.constant 1.000000e+00 : f32
    %11 = vector.broadcast %cst_8 : f32 to vector<1x512xf32>
    %12 = arith.maximumf %11, %10 : vector<1x512xf32>
    %13 = vector.broadcast %cst_9 : f32 to vector<1x512xf32>
    %14 = arith.minimumf %13, %12 : vector<1x512xf32>
    %15 = arith.mulf %8, %14 : vector<1x512xf32>
    %c0_10 = arith.constant 0 : index
    %c0_11 = arith.constant 0 : index
    %16 = vector.load %arg5[%c0_10, %c0_11] : memref<1x512xf32, #tpu.memory_space<vmem>>, vector<1x512xf32>
    tpu.vector_store %arg5[%c0_10, %c0_11], %15 {strides = array<i32>} : memref<1x512xf32, #tpu.memory_space<vmem>>, vector<1x512xf32>,
    return
  }
  func.func @transform_0(%arg0: i32) -> (i32, i32) {
    %c0_i32 = arith.constant 0 : i32
    %c0_i32_0 = arith.constant 0 : i32
    %c0_i32_1 = arith.constant 0 : i32
    return %c0_i32, %c0_i32_0 : i32, i32
  }
  func.func @transform_1(%arg0: i32) -> (i32, i32) {
    %c0_i32 = arith.constant 0 : i32
    %c0_i32_0 = arith.constant 0 : i32
    %c0_i32_1 = arith.constant 0 : i32
    return %c0_i32, %c0_i32_0 : i32, i32
  }
  func.func @transform_2(%arg0: i32) -> (i32, i32) {
    %c0_i32 = arith.constant 0 : i32
    %c0_i32_0 = arith.constant 0 : i32
    %c0_i32_1 = arith.constant 0 : i32
    return %c0_i32, %c0_i32_0 : i32, i32
  }
  func.func @transform_3(%arg0: i32) -> (i32, i32) {
    %c0_i32 = arith.constant 0 : i32
    %c0_i32_0 = arith.constant 0 : i32
    %c0_i32_1 = arith.constant 0 : i32
    return %c0_i32, %c0_i32_0 : i32, i32
  }
  func.func @transform_4(%arg0: i32) -> (i32, i32) {
    %c0_i32 = arith.constant 0 : i32
    %c0_i32_0 = arith.constant 0 : i32
    %c0_i32_1 = arith.constant 0 : i32
    return %c0_i32, %c0_i32_0 : i32, i32
  }
}

</mosaic_0001>

<bundles_post_ra>
// kernel: linear_hardswish.1
= control target key start
LH: loop header
LB: loop body
LE: loop exit
PB: predicated region body
PF: predicated region fallthrough
CT: control target
= control target key end

     0   :  { %9 = vsyncpa [#allocation3], 0  ;;  %s603_s0 = inlined_call_operand.vmem [shape: bf16[1,288], index: 0, kind: input, shape index: {}]   ;;  %s604_s1 = inlined_call_operand.hbm [shape: s8[288,512], index: 1, kind: input, shape index: {}]   ;;  %s605_s2 = inlined_call_operand.vmem [shape: f32[1,512], index: 2, kind: input, shape index: {}]   ;;  %s606_s3 = inlined_call_operand.vmem [shape: f32[1,512], index: 3, kind: input, shape index: {}]   ;;  %s607_s4 = inlined_call_operand.hbm [shape: f32[1,512], index: 4, kind: output, shape index: {}]  }
   0x1   :  { %10 = vsyncpa [#allocation4], 0  ;;  %s518_s15 = smov [#allocation2]   ;;  %s470_s19 = scalar_lea.hbm %s604_s1, 4608 }
   0x2   :  { %s18_s16 = sshll.u32 %s518_s15, 4  ;;  %p471_p0 = scmp.ne.s32.totalorder %s604_s1, %s470_s19  ;;  %s19_s16 = int_to_ptr.vmem [resolvable:$true] %s18_s16 }
   0x3   :  { %p474_p1 = scmp.lt.u32.totalorder %s470_s19, %s604_s1 }
   0x5   :  { %p476_p2 = pnand %p474_p1, %p471_p0 }
   0x7   :  { %479 = shalt.err (!%p476_p2)
}
   0x8   :  { %s480_s24 = scalar_lea.vmem %s19_s16, 4608  ;;  %p485_p4 = scmp.lt.s32.totalorder %s19_s16, %s19_s16 }
   0x9   :  { %p481_p3 = scmp.ne.s32.totalorder %s19_s16, %s480_s24  ;;  %p486_p5 = scmp.lt.s32.totalorder %s480_s24, %s480_s24 }
   0xb   :  { %p487_p6 = por %p486_p5, %p485_p4 }
   0xd   :  { %p488_p7 = pnand %p487_p6, %p481_p3 }
   0xf   :  { %491 = shalt.err (!%p488_p7)
}
  0x10   :  { %s519_s25 = smov 512   ;;  %s520_s26 = smov 32  }
  0x11   :  { %24 = dma.hbm_to_vmem [thread:$0]  %s604_s1, 4608, %s19_s16, [#allocation3], %s519_s25, %s519_s25, %s520_s26  }
  0x12   :  { %514 = dma.done.wait [#allocation3], 4608  }
  0x13   :  { %515 = vsyncadd [#allocation3], 4294962688  ;;  %v34_v0 = vld [vmem:[#allocation2 + $0x8] sm:$0xff]  ;;  %v36_v1 = vld [vmem:[#allocation2 + $0x18] sm:$0xff]  ;;  %v521_v18 = vmov 1966171168   ;;  %v154_v20 = vlaneseq }
  0x14   :  { %v33_v2 = vld [vmem:[#allocation2] sm:$0xff]  ;;  %v70_v3 = vunpack.c.l.s8.bf16 %v34_v0  ;;  %v74_v4 = vunpack.c.h.s8.bf16 %v34_v0  ;;  %v72_v5 = vunpack.c.l.s8.bf16 %v36_v1  ;;  %v76_v6 = vunpack.c.h.s8.bf16 %v36_v1  ;;  %v35_v7 = vld [vmem:[#allocation2 + $0x10] sm:$0xff]  ;;  %v38_v10 = vld [vmem:[#allocation2 + $0x28] sm:$0xff] }
  0x15   :  { %v69_v8 = vunpack.c.l.s8.bf16 %v33_v2  ;;  %v71_v9 = vunpack.c.l.s8.bf16 %v35_v7  ;;  %v40_v11 = vld [vmem:[#allocation2 + $0x38] sm:$0xff]  ;;  %v73_v12 = vunpack.c.h.s8.bf16 %v33_v2  ;;  %v75_v13 = vunpack.c.h.s8.bf16 %v35_v7  ;;  %v37_v16 = vld [vmem:[#allocation2 + $0x20] sm:$0xff]  ;;  %v39_v17 = vld [vmem:[#allocation2 + $0x30] sm:$0xff] }
  0x16   :  { %172 = vmatprep.subr.bf16.mxu0 %v70_v3  ;;  %254 = vmatprep.subr.bf16.mxu1 %v72_v5  ;;  %v78_v14 = vunpack.c.l.s8.bf16 %v38_v10  ;;  %v80_v15 = vunpack.c.l.s8.bf16 %v40_v11  ;;  %v152_v19 = vunpack.c.l.s4 %v521_v18  ;;  %v77_v21 = vunpack.c.l.s8.bf16 %v37_v16  ;;  %v42_v25 = vld [vmem:[#allocation2 + $0x48] sm:$0xff]  ;;  %v44_v26 = vld [vmem:[#allocation2 + $0x58] sm:$0xff]  ;;  %v41_v33 = vld [vmem:[#allocation2 + $0x40] sm:$0xff] }
  0x17   :  { %173 = vmatpush1.bf16.msra.mxu0 %v69_v8  ;;  %255 = vmatpush1.bf16.msra.mxu1 %v71_v9  ;;  %v79_v22 = vunpack.c.l.s8.bf16 %v39_v17  ;;  %v82_v23 = vunpack.c.h.s8.bf16 %v38_v10  ;;  %v84_v24 = vunpack.c.h.s8.bf16 %v40_v11  ;;  %v562_v28 = vshrl.u32 %v154_v20, 7  ;;  %v43_v34 = vld [vmem:[#allocation2 + $0x50] sm:$0xff]  ;;  %v567_v35 = vld.sshfl [vmem:[%s603_s0] sm:$0x13 pattern:$0x75316420] }
  0x18   :  { %174 = vmatprep.subr.bf16.mxu0 %v74_v4  ;;  %256 = vmatprep.subr.bf16.mxu1 %v76_v6  ;;  %v153_v27 = vunpack.c.0.s8 %v152_v19  ;;  %v81_v29 = vunpack.c.h.s8.bf16 %v37_v16  ;;  %v83_v30 = vunpack.c.h.s8.bf16 %v39_v17  ;;  %v86_v31 = vunpack.c.l.s8.bf16 %v42_v25  ;;  %v46_v42 = vld [vmem:[#allocation2 + $0x68] sm:$0xff]  ;;  %v48_v43 = vld [vmem:[#allocation2 + $0x78] sm:$0xff]  ;;  %v45_v49 = vld [vmem:[#allocation2 + $0x60] sm:$0xff] }
  0x19   :  { %v88_v32 = vunpack.c.l.s8.bf16 %v44_v26  ;;  %v85_v37 = vunpack.c.l.s8.bf16 %v41_v33  ;;  %v87_v38 = vunpack.c.l.s8.bf16 %v43_v34  ;;  %v90_v39 = vunpack.c.h.s8.bf16 %v42_v25  ;;  %v47_v50 = vld [vmem:[#allocation2 + $0x70] sm:$0xff]  ;;  %v50_v55 = vld [vmem:[#allocation2 + $0x88] sm:$0xff]  ;;  %v52_v56 = vld [vmem:[#allocation2 + $0x98] sm:$0xff] }
  0x1a   :  { %v570_v36 = vsub.s32 %v153_v27, %v562_v28  ;;  %v92_v40 = vunpack.c.h.s8.bf16 %v44_v26  ;;  %v150_v41 = vcombine.high %v567_v35, %v567_v35  ;;  %v89_v45 = vunpack.c.h.s8.bf16 %v41_v33  ;;  %v49_v61 = vld [vmem:[#allocation2 + $0x80] sm:$0xff]  ;;  %v51_v62 = vld [vmem:[#allocation2 + $0x90] sm:$0xff]  ;;  %v54_v3 = vld [vmem:[#allocation2 + $0xa8] sm:$0xff] }
  0x1b   :  { %175 = vmatpush1.bf16.msra.mxu0 %v73_v12  ;;  %257 = vmatpush1.bf16.msra.mxu1 %v75_v13  ;;  %v91_v46 = vunpack.c.h.s8.bf16 %v43_v34  ;;  %v94_v47 = vunpack.c.l.s8.bf16 %v46_v42  ;;  %v96_v48 = vunpack.c.l.s8.bf16 %v48_v43  ;;  %v93_v51 = vunpack.c.l.s8.bf16 %v45_v49  ;;  %v56_v4 = vld [vmem:[#allocation2 + $0xb8] sm:$0xff]  ;;  %v53_v9 = vld [vmem:[#allocation2 + $0xa0] sm:$0xff]  ;;  %v55_v10 = vld [vmem:[#allocation2 + $0xb0] sm:$0xff] }
  0x1c   :  { %176 = vmatprep.subr.bf16.mxu0 %v78_v14  ;;  %258 = vmatprep.subr.bf16.mxu1 %v80_v15  ;;  %v164_v44 = vrot.slane %v150_v41, %v570_v36  ;;  %v95_v52 = vunpack.c.l.s8.bf16 %v47_v50  ;;  %v98_v53 = vunpack.c.h.s8.bf16 %v46_v42  ;;  %v100_v54 = vunpack.c.h.s8.bf16 %v48_v43  ;;  %v58_v15 = vld [vmem:[#allocation2 + $0xc8] sm:$0xff]  ;;  %v60_v16 = vld [vmem:[#allocation2 + $0xd8] sm:$0xff] }
  0x1d   :  { %v97_v57 = vunpack.c.h.s8.bf16 %v45_v49  ;;  %v99_v58 = vunpack.c.h.s8.bf16 %v47_v50  ;;  %v102_v59 = vunpack.c.l.s8.bf16 %v50_v55  ;;  %v104_v60 = vunpack.c.l.s8.bf16 %v52_v56  ;;  %v66_v43 = vld [vmem:[#allocation2 + $0x108] sm:$0xff]  ;;  %v65_v49 = vld [vmem:[#allocation2 + $0x100] sm:$0xff]  ;;  %v67_v50 = vld [vmem:[#allocation2 + $0x110] sm:$0xff] }
  0x1e   :  { %204 = vmatprep.mubr.bf16.mxu0 %v164_v44  ;;  %286 = vmatprep.mubr.bf16.mxu1 %v164_v44  ;;  %v101_v63 = vunpack.c.l.s8.bf16 %v49_v61  ;;  %v103_v0 = vunpack.c.l.s8.bf16 %v51_v62  ;;  %v106_v1 = vunpack.c.h.s8.bf16 %v50_v55  ;;  %v108_v2 = vunpack.c.h.s8.bf16 %v52_v56  ;;  %v68_v44 = vld [vmem:[#allocation2 + $0x118] sm:$0xff] }
  0x1f   :  { %177 = vmatpush1.bf16.msra.mxu0 %v77_v21  ;;  %259 = vmatpush1.bf16.msra.mxu1 %v79_v22  ;;  %v105_v5 = vunpack.c.h.s8.bf16 %v49_v61  ;;  %v107_v6 = vunpack.c.h.s8.bf16 %v51_v62  ;;  %v110_v7 = vunpack.c.l.s8.bf16 %v54_v3  ;;  %v112_v8 = vunpack.c.l.s8.bf16 %v56_v4  ;;  %v57_v22 = vld [vmem:[#allocation2 + $0xc0] sm:$0xff]  ;;  %v336_v61 = vld [vmem:[%s605_s2] sm:$0xf]  ;;  %s523_s2 = smov [#allocation5]  }
  0x20   :  { %178 = vmatprep.subr.bf16.mxu0 %v82_v23  ;;  %260 = vmatprep.subr.bf16.mxu1 %v84_v24  ;;  %v109_v11 = vunpack.c.l.s8.bf16 %v53_v9  ;;  %v111_v12 = vunpack.c.l.s8.bf16 %v55_v10  ;;  %v114_v13 = vunpack.c.h.s8.bf16 %v54_v3  ;;  %v116_v14 = vunpack.c.h.s8.bf16 %v56_v4  ;;  %v59_v23 = vld [vmem:[#allocation2 + $0xd0] sm:$0xff] }
  0x21   :  { %v113_v17 = vunpack.c.h.s8.bf16 %v53_v9  ;;  %v115_v18 = vunpack.c.h.s8.bf16 %v55_v10  ;;  %v118_v19 = vunpack.c.l.s8.bf16 %v58_v15  ;;  %v120_v21 = vunpack.c.l.s8.bf16 %v60_v16 }
  0x22   :  { %v117_v24 = vunpack.c.l.s8.bf16 %v57_v22  ;;  %v119_v25 = vunpack.c.l.s8.bf16 %v59_v23  ;;  %v122_v26 = vunpack.c.h.s8.bf16 %v58_v15  ;;  %v124_v27 = vunpack.c.h.s8.bf16 %v60_v16 }
  0x23   :  { %179 = vmatpush1.bf16.msra.mxu0 %v81_v29  ;;  %261 = vmatpush1.bf16.msra.mxu1 %v83_v30  ;;  %v62_v29 = vld [vmem:[#allocation2 + $0xe8] sm:$0xff]  ;;  %v64_v30 = vld [vmem:[#allocation2 + $0xf8] sm:$0xff]  ;;  %v140_v55 = vunpack.c.h.s8.bf16 %v68_v44  ;;  %v137_v56 = vunpack.c.h.s8.bf16 %v65_v49  ;;  %vm168_vm0 = vcmask 261120   ;;  %v344_v62 = vsub.s32 1, %v562_v28 }
  0x24   :  { %180 = vmatprep.subr.bf16.mxu0 %v86_v31  ;;  %262 = vmatprep.subr.bf16.mxu1 %v88_v32  ;;  %v121_v31 = vunpack.c.h.s8.bf16 %v57_v22  ;;  %v123_v32 = vunpack.c.h.s8.bf16 %v59_v23  ;;  %v126_v33 = vunpack.c.l.s8.bf16 %v62_v29  ;;  %v128_v34 = vunpack.c.l.s8.bf16 %v64_v30 }
  0x25   :  { %v130_v41 = vunpack.c.h.s8.bf16 %v62_v29  ;;  %v132_v42 = vunpack.c.h.s8.bf16 %v64_v30  ;;  %v345_v3 = vrot.slane %v336_v61, %v344_v62  ;;  %vm435_vm1 = vcmp.lt.s32.totalorder %v154_v20, 512 }
  0x27   :  { %181 = vmatpush1.bf16.msra.mxu0 %v85_v37  ;;  %263 = vmatpush1.bf16.msra.mxu1 %v87_v38  ;;  %v61_v37 = vld [vmem:[#allocation2 + $0xe0] sm:$0xff]  ;;  %v63_v38 = vld [vmem:[#allocation2 + $0xf0] sm:$0xff] }
  0x28   :  { %182 = vmatprep.subr.bf16.mxu0 %v90_v39  ;;  %264 = vmatprep.subr.bf16.mxu1 %v92_v40  ;;  %v125_v39 = vunpack.c.l.s8.bf16 %v61_v37  ;;  %v127_v40 = vunpack.c.l.s8.bf16 %v63_v38 }
  0x2b   :  { %183 = vmatpush1.bf16.msra.mxu0 %v89_v45  ;;  %265 = vmatpush1.bf16.msra.mxu1 %v91_v46  ;;  %v129_v45 = vunpack.c.h.s8.bf16 %v61_v37  ;;  %v131_v46 = vunpack.c.h.s8.bf16 %v63_v38 }
  0x2c   :  { %184 = vmatprep.subr.bf16.mxu0 %v94_v47  ;;  %266 = vmatprep.subr.bf16.mxu1 %v96_v48  ;;  %v134_v47 = vunpack.c.l.s8.bf16 %v66_v43  ;;  %v136_v48 = vunpack.c.l.s8.bf16 %v68_v44 }
  0x2f   :  { %185 = vmatpush1.bf16.msra.mxu0 %v93_v51  ;;  %267 = vmatpush1.bf16.msra.mxu1 %v95_v52  ;;  %v157_v51 = vrot.slane %v567_v35, %v570_v36  ;;  %v133_v52 = vunpack.c.l.s8.bf16 %v65_v49 }
  0x30   :  { %186 = vmatprep.subr.bf16.mxu0 %v98_v53  ;;  %268 = vmatprep.subr.bf16.mxu1 %v100_v54  ;;  %v135_v53 = vunpack.c.l.s8.bf16 %v67_v50  ;;  %v138_v54 = vunpack.c.h.s8.bf16 %v66_v43 }
  0x31   :  { %v165_v35 = vcombine.high %v157_v51, %v157_v51 }
  0x33   :  { %187 = vmatpush1.bf16.msra.mxu0 %v97_v57  ;;  %269 = vmatpush1.bf16.msra.mxu1 %v99_v58  ;;  %v139_v57 = vunpack.c.h.s8.bf16 %v67_v50  ;;  %v522_v58 = vmov 0  }
  0x34   :  { %188 = vmatprep.subr.bf16.mxu0 %v102_v59  ;;  %270 = vmatprep.subr.bf16.mxu1 %v104_v60  ;;  %v340_v59 = vsub.s32 0, %v562_v28  ;;  %v348_v60 = vsub.s32 2, %v562_v28 }
  0x37   :  { %189 = vmatpush1.bf16.msra.mxu0 %v101_v63  ;;  %271 = vmatpush1.bf16.msra.mxu1 %v103_v0  ;;  %v352_v63 = vsub.s32 3, %v562_v28  ;;  %v362_v0 = vld [vmem:[%s606_s3] sm:$0xf]  ;;  %s444_s3 = sshll.u32 %s523_s2, 4  ;;  %s445_s3 = int_to_ptr.vmem [resolvable:$true] %s444_s3 }
  0x38   :  { %190 = vmatprep.subr.bf16.mxu0 %v106_v1  ;;  %272 = vmatprep.subr.bf16.mxu1 %v108_v2  ;;  %v341_v1 = vrot.slane %v336_v61, %v340_v59  ;;  %v349_v2 = vrot.slane %v336_v61, %v348_v60  ;;  %v371_v9 = vrot.slane %v362_v0, %v344_v62  ;;  %s492_s7 = scalar_lea.vmem %s445_s3, 64  ;;  %p497_p9 = scmp.lt.s32.totalorder %s445_s3, %s445_s3 }
  0x39   :  { %v353_v4 = vrot.slane %v336_v61, %v352_v63  ;;  %v379_v10 = vrot.slane %v362_v0, %v352_v63  ;;  %p493_p8 = scmp.ne.s32.totalorder %s445_s3, %s492_s7  ;;  %p498_p10 = scmp.lt.s32.totalorder %s492_s7, %s492_s7 }
  0x3b   :  { %191 = vmatpush1.bf16.msra.mxu0 %v105_v5  ;;  %273 = vmatpush1.bf16.msra.mxu1 %v107_v6  ;;  %v367_v5 = vrot.slane %v362_v0, %v340_v59  ;;  %v375_v6 = vrot.slane %v362_v0, %v348_v60  ;;  %p499_p11 = por %p498_p10, %p497_p9 }
  0x3c   :  { %192 = vmatprep.subr.bf16.mxu0 %v110_v7  ;;  %274 = vmatprep.subr.bf16.mxu1 %v112_v8 }
  0x3d   :  { %p500_p12 = pnand %p499_p11, %p493_p8 }
  0x3f   :  { %193 = vmatpush1.bf16.msra.mxu0 %v109_v11  ;;  %275 = vmatpush1.bf16.msra.mxu1 %v111_v12 }
  0x40   :  { %194 = vmatprep.subr.bf16.mxu0 %v114_v13  ;;  %276 = vmatprep.subr.bf16.mxu1 %v116_v14 }
  0x43   :  { %195 = vmatpush1.bf16.msra.mxu0 %v113_v17  ;;  %277 = vmatpush1.bf16.msra.mxu1 %v115_v18 }
  0x44   :  { %196 = vmatprep.subr.bf16.mxu0 %v118_v19  ;;  %278 = vmatprep.subr.bf16.mxu1 %v120_v21 }
  0x47   :  { %197 = vmatpush1.bf16.msra.mxu0 %v117_v24  ;;  %279 = vmatpush1.bf16.msra.mxu1 %v119_v25 }
  0x48   :  { %198 = vmatprep.subr.bf16.mxu0 %v122_v26  ;;  %280 = vmatprep.subr.bf16.mxu1 %v124_v27 }
  0x4b   :  { %199 = vmatpush1.bf16.msra.mxu0 %v121_v31  ;;  %281 = vmatpush1.bf16.msra.mxu1 %v123_v32 }
  0x4c   :  { %200 = vmatprep.subr.bf16.mxu0 %v126_v33  ;;  %282 = vmatprep.subr.bf16.mxu1 %v128_v34 }
  0x4f   :  { %201 = vmatpush1.bf16.msra.mxu0 %v125_v39  ;;  %283 = vmatpush1.bf16.msra.mxu1 %v127_v40 }
  0x50   :  { %202 = vmatprep.subr.bf16.mxu0 %v130_v41  ;;  %284 = vmatprep.subr.bf16.mxu1 %v132_v42 }
  0x53   :  { %203 = vmatpush1.bf16.msra.mxu0 %v129_v45  ;;  %285 = vmatpush1.bf16.msra.mxu1 %v131_v46 }
  0x54   :  { %213 = vmatprep.subr.bf16.mxu0 %v134_v47  ;;  %295 = vmatprep.subr.bf16.mxu1 %v136_v48 }
  0x56   :  { %205 = vmatmul.mubr.bf16.vlgmr.msra.gmra.mrb[0].mxu0 %v157_v51  ;;  %287 = vmatmul.mubr.bf16.vlgmr.msra.gmra.mrb[0].mxu1 %v157_v51 }
  0x57   :  { %214 = vmatpush1.bf16.msra.mxu0 %v133_v52  ;;  %296 = vmatpush1.bf16.msra.mxu1 %v135_v53 }
  0x58   :  { %215 = vmatprep.subr.bf16.mxu0 %v138_v54  ;;  %297 = vmatprep.subr.bf16.mxu1 %v140_v55 }
  0x59   :  { %245 = vmatprep.mubr.bf16.mxu0 %v522_v58  ;;  %327 = vmatprep.mubr.bf16.mxu1 %v522_v58 }
  0x5b   :  { %216 = vmatpush1.bf16.msra.mxu0 %v137_v56  ;;  %298 = vmatpush1.bf16.msra.mxu1 %v139_v57 }
  0x62   :  { %454 = vmatmul.mubr.msk.bf16.vlgmr.msra.gmra.mrb[0].mxu0 %vm168_vm0, %v165_v35  ;;  %455 = vmatmul.mubr.msk.bf16.vlgmr.msra.gmra.mrb[0].mxu1 %vm168_vm0, %v165_v35 }
 0x135   :  { %v247_v7 = vpop.f32.mrb[0].mxu0  ;;  %v329_v8 = vpop.f32.mrb[0].mxu1 }
 0x136   :  { %v358_v11 = vmul.f32 %v341_v1, %v247_v7  ;;  %v360_v12 = vmul.f32 %v349_v2, %v329_v8  ;;  %v249_v13 = vpop.f32.mrb[1].mxu0  ;;  %v331_v14 = vpop.f32.mrb[1].mxu1 }
 0x137   :  { %v359_v15 = vmul.f32 %v345_v3, %v249_v13  ;;  %v361_v28 = vmul.f32 %v353_v4, %v331_v14  ;;  %v251_v16 = vpop.f32.mrb[2].mxu0  ;;  %v333_v17 = vpop.f32.mrb[2].mxu1 }
 0x138   :  { %v384_v18 = vadd.f32 %v367_v5, %v358_v11  ;;  %v386_v19 = vadd.f32 %v375_v6, %v360_v12  ;;  %v252_v21 = vpop.f32.mrb[3].mxu0  ;;  %v334_v22 = vpop.f32.mrb[3].mxu1 }
 0x139   :  { %v385_v23 = vadd.f32 %v371_v9, %v359_v15  ;;  %v387_v24 = vadd.f32 %v379_v10, %v361_v28 }
 0x13a   :  { %v388_v25 = vmul.f32 0.16666667, %v384_v18  ;;  %v390_v26 = vmul.f32 0.16666667, %v386_v19 }
 0x13b   :  { %v389_v27 = vmul.f32 0.16666667, %v385_v23  ;;  %v391_v29 = vmul.f32 0.16666667, %v387_v24 }
 0x13c   :  { %v392_v30 = vmax.f32 %v388_v25, 0.0  ;;  %v394_v31 = vmax.f32 %v390_v26, 0.0 }
 0x13d   :  { %v393_v32 = vmax.f32 %v389_v27, 0.0  ;;  %v395_v33 = vmax.f32 %v391_v29, 0.0 }
 0x13e   :  { %v396_v34 = vmin.f32 %v392_v30, 1.0  ;;  %v398_v37 = vmin.f32 %v394_v31, 1.0 }
 0x13f   :  { %v397_v38 = vmin.f32 %v393_v32, 1.0  ;;  %v399_v39 = vmin.f32 %v395_v33, 1.0 }
 0x140   :  { %v400_v40 = vmul.f32 %v396_v34, %v384_v18  ;;  %v402_v41 = vmul.f32 %v398_v37, %v386_v19 }
 0x141   :  { %v401_v42 = vmul.f32 %v397_v38, %v385_v23  ;;  %v403_v43 = vmul.f32 %v399_v39, %v387_v24 }
 0x143   :  { %v408_v44 = vcombine.low %v400_v40, %v401_v42  ;;  %v409_v45 = vcombine.low %v402_v41, %v403_v43 }
 0x145   :  { %v416_v46 = vrot.slane %v408_v44, %v570_v36  ;;  %v423_v47 = vrot.slane %v409_v45, %v570_v36 }
 0x147   :  { %v424_v48 = vcombine.low %v416_v46, %v423_v47 }
 0x149   :  { %v431_v49 = vrot.slane %v424_v48, %v570_v36 }
 0x14b   :  { %437 = vst.msk [vmem:[#allocation5] sm:$0xf] %vm435_vm1, %v431_v49 }
 0x14c   :  { %503 = shalt.err (!%p500_p12)
}
 0x14d   :  { %s504_s10 = scalar_lea.hbm %s607_s4, 64 }
 0x14e   :  { %p505_p13 = scmp.ne.s32.totalorder %s607_s4, %s504_s10  ;;  %p508_p0 = scmp.lt.u32.totalorder %s504_s10, %s607_s4 }
 0x150   :  { %p510_p1 = pnand %p508_p0, %p505_p13 }
 0x152   :  { %513 = shalt.err (!%p510_p1)
}
 0x153   :  { %447 = dma.vmem_to_hbm [thread:$0]  %s445_s3, 64, %s607_s4, [#allocation4]  }
 0x154   :  { %516 = dma.done.wait [#allocation4], 64  }
 0x155   :  { %517 = vsyncadd [#allocation4], 4294967232 }
 0x156   :  { %451 = vsyncpa [#allocation3], 1 }
 0x157   :  { %452 = vsyncpa [#allocation4], 1 }

</bundles_post_ra>
